<compile_context>
chip_gen: v5e
topology: v5e:2x2
jax: 0.10.0
libtpu: 0.0.40
codegen_flags: <defaults>
</compile_context>

<pallas_src>
import math
import functools

import jax
import jax.numpy as jnp
from jax.experimental import pallas as pl
from jax.experimental.pallas import tpu as pltpu

F32 = jnp.float32
BF16 = jnp.bfloat16

VMEM_LIMIT = 64 * 1024 * 1024  # scoped VMEM for the weight-heavy kernels


# ----------------------------- tiling helpers --------------------------------

def _token_tile(n):
    for cand in (256, 128):
        if n % cand == 0:
            return cand
    return n


def _row_tile(m):
    for cand in (512, 256, 128):
        if m % cand == 0:
            return cand
    return m


def _head_tile(num_heads, n_tokens, budget_bytes=8 * 1024 * 1024):
    """Largest divisor of num_heads whose (ht, N, N) f32 score tile fits budget."""
    ht = num_heads
    while ht > 1 and ht * n_tokens * n_tokens * 4 > budget_bytes:
        ht -= 1
        while num_heads % ht:
            ht -= 1
    return ht


# ----------------------------- in-kernel helpers -----------------------------

def _silu(v):
    # sigmoid via EUP exp + approx reciprocal (divide kept off the VPU).
    return v * pl.reciprocal(1.0 + jnp.exp(-v), approx=True)


def _gelu(v):
    # TODO(synk): F.gelu default is the exact erf-GELU; erf has no verified
    # Mosaic lowering, so the tanh approximation is used (max abs diff ~1e-3).
    c = 0.7978845608028654  # sqrt(2/pi)
    return 0.5 * v * (1.0 + jnp.tanh(c * (v + 0.044715 * v * v * v)))


def _layer_norm(v, eps=1e-5):
    # LayerNorm(elementwise_affine=False), biased variance, eps=1e-5, f32 stats.
    mu = jnp.mean(v, axis=-1, keepdims=True)
    var = jnp.mean((v - mu) ** 2, axis=-1, keepdims=True)
    return (v - mu) * jax.lax.rsqrt(var + eps)


# ----------------------------- Pallas kernels --------------------------------

def _linear_kernel(x_ref, w_ref, b_ref, o_ref):
    o_ref[...] = (jnp.dot(x_ref[...].astype(BF16), w_ref[...],
                          preferred_element_type=F32)
                  + b_ref[...]).astype(o_ref.dtype)


def tiled_linear(x, w, b):
    """x: (M, K) f32, w: (K, N) bf16, b: (1, N) f32 -> (M, N) f32, tiled over M."""
    M, K = x.shape
    N = w.shape[1]
    tm = _row_tile(M)
    return pl.pallas_call(
        _linear_kernel,
        out_shape=jax.ShapeDtypeStruct((M, N), F32),
        grid=(M // tm,),
        in_specs=[
            pl.BlockSpec((tm, K), lambda i: (i, 0)),
            pl.BlockSpec((K, N), lambda i: (0, 0)),
            pl.BlockSpec((1, N), lambda i: (0, 0)),
        ],
        out_specs=pl.BlockSpec((tm, N), lambda i: (i, 0)),
        compiler_params=pltpu.CompilerParams(
            dimension_semantics=("parallel",), vmem_limit_bytes=VMEM_LIMIT),
        cost_estimate=pl.CostEstimate(
            flops=2 * M * K * N, transcendentals=0,
            bytes_accessed=4 * M * K + 2 * K * N + 4 * M * N),
    )(x, w, b)


def _timestep_mlp_kernel(temb_ref, w1_ref, b1_ref, w2_ref, b2_ref, o_ref):
    h = jnp.dot(temb_ref[...].astype(BF16), w1_ref[...],
                preferred_element_type=F32) + b1_ref[...]
    h = _silu(h)
    o_ref[...] = (jnp.dot(h.astype(BF16), w2_ref[...],
                          preferred_element_type=F32)
                  + b2_ref[...]).astype(o_ref.dtype)


def timestep_embedder(t, w1, b1, w2, b2, freq_dim=256, max_period=10000):
    """Sinusoidal embedding (glue) + fused bf16-MXU MLP (Pallas). t: (M,)."""
    half = freq_dim // 2
    freqs = jnp.exp(-math.log(max_period) * jnp.arange(half, dtype=F32) / half)
    args = t.astype(F32)[:, None] * freqs[None]
    temb = jnp.concatenate([jnp.cos(args), jnp.sin(args)], axis=-1)
    M = t.shape[0]
    H = w1.shape[1]
    return pl.pallas_call(
        _timestep_mlp_kernel,
        out_shape=jax.ShapeDtypeStruct((M, H), F32),
    )(temb, w1, b1, w2, b2)


def _cond_mod_kernel(c_ref, w_ref, b_ref, o_ref):
    cs = _silu(c_ref[...]).astype(BF16)
    o_ref[...] = (jnp.dot(cs, w_ref[...], preferred_element_type=F32)
                  + b_ref[...]).astype(o_ref.dtype)


def cond_modulation(c, w, b):
    """adaLN / final modulation: silu(c) @ w + b.  c: (B, H) -> (B, 1, kH) f32."""
    B = c.shape[0]
    kH = w.shape[1]
    out = pl.pallas_call(
        _cond_mod_kernel,
        out_shape=jax.ShapeDtypeStruct((B, kH), F32),
    )(c, w, b)
    return out[:, None, :]  # keep trailing block dims >= 2-D for the token kernels


def _norm_mod_qkv_kernel(x_ref, cmod_ref, w_ref, b_ref, o_ref, *, hidden):
    H = hidden
    x = x_ref[0]            # (TN, H) f32
    cm = cmod_ref[0]        # (1, 6H) f32
    shift_msa = cm[:, 0:H]
    scale_msa = cm[:, H:2 * H]
    xm = _layer_norm(x) * (1.0 + scale_msa) + shift_msa
    qkv = jnp.dot(xm.astype(BF16), w_ref[...],
                  preferred_element_type=F32) + b_ref[...]
    o_ref[...] = qkv[None].astype(o_ref.dtype)


def norm_mod_qkv(x, cmod, w, b):
    """LayerNorm + adaLN modulate + QKV projection, gridded over (B, token tiles)."""
    B, N, H = x.shape
    tn = _token_tile(N)
    return pl.pallas_call(
        functools.partial(_norm_mod_qkv_kernel, hidden=H),
        out_shape=jax.ShapeDtypeStruct((B, N, 3 * H), BF16),
        grid=(B, N // tn),
        in_specs=[
            pl.BlockSpec((1, tn, H), lambda b, i: (b, i, 0)),
            pl.BlockSpec((1, 1, 6 * H), lambda b, i: (b, 0, 0)),
            # TODO(synk): constant-index weight blocks are still double-buffered
            # by default; pipeline_mode=pl.Buffered(1) would halve their VMEM.
            pl.BlockSpec((H, 3 * H), lambda b, i: (0, 0)),
            pl.BlockSpec((1, 3 * H), lambda b, i: (0, 0)),
        ],
        out_specs=pl.BlockSpec((1, tn, 3 * H), lambda b, i: (b, i, 0)),
        compiler_params=pltpu.CompilerParams(
            dimension_semantics=("parallel", "parallel"),
            vmem_limit_bytes=VMEM_LIMIT),
        cost_estimate=pl.CostEstimate(
            flops=2 * B * N * H * 3 * H, transcendentals=0,
            bytes_accessed=4 * B * N * H + 2 * H * 3 * H + 2 * B * N * 3 * H),
    )(x, cmod, w, b)


def _attention_kernel(q_ref, k_ref, v_ref, o_ref, *, scale):
    q = q_ref[0]            # (HT, N, dh) bf16
    k = k_ref[0]
    v = v_ref[0]
    s = jnp.einsum('hqd,hkd->hqk', q, k,
                   preferred_element_type=F32) * scale
    s = s - jnp.max(s, axis=-1, keepdims=True)
    p = jnp.exp(s)
    inv = pl.reciprocal(jnp.sum(p, axis=-1, keepdims=True), approx=True)
    o = jnp.einsum('hqk,hkd->hqd', p.astype(BF16), v,
                   preferred_element_type=F32)
    o_ref[...] = (o * inv)[None].astype(o_ref.dtype)


def attention(q, k, v):
    """q/k/v: (B, nh, N, dh) bf16 -> (B, nh, N, dh) bf16; softmax kept in f32."""
    B, nh, N, dh = q.shape
    ht = _head_tile(nh, N)
    scale = 1.0 / math.sqrt(dh)
    spec = pl.BlockSpec((1, ht, N, dh), lambda b, h: (b, h, 0, 0))
    # TODO(synk): for very large N, tile queries and loop KV tiles with an
    # online softmax instead of materializing the (ht, N, N) score tile.
    return pl.pallas_call(
        functools.partial(_attention_kernel, scale=scale),
        out_shape=jax.ShapeDtypeStruct((B, nh, N, dh), BF16),
        grid=(B, nh // ht),
        in_specs=[spec, spec, spec],
        out_specs=spec,
        compiler_params=pltpu.CompilerParams(
            dimension_semantics=("parallel", "parallel"),
            vmem_limit_bytes=VMEM_LIMIT),
        cost_estimate=pl.CostEstimate(
            flops=4 * B * nh * N * N * dh,
            transcendentals=B * nh * N * N,
            bytes_accessed=8 * B * nh * N * dh),
    )(q, k, v)


def _proj_mlp_kernel(a_ref, cmod_ref, pw_ref, pb_ref, w1_ref, b1_ref,
                     w2_ref, b2_ref, o_ref, *, hidden):
    H = hidden
    a = a_ref[0]            # (TN, H) bf16 attention output
    cm = cmod_ref[0]        # (1, 6H) f32
    gate_msa = cm[:, 2 * H:3 * H]
    shift_mlp = cm[:, 3 * H:4 * H]
    scale_mlp = cm[:, 4 * H:5 * H]
    gate_mlp = cm[:, 5 * H:6 * H]

    y = jnp.dot(a, pw_ref[...], preferred_element_type=F32) + pb_ref[...]
    # NOTE: faithful to the source: x = proj(attn); x = x + gate * x
    # (the block-input residual is dropped, exactly as written in PyTorch).
    x1 = y * (1.0 + gate_msa)

    xm = _layer_norm(x1) * (1.0 + scale_mlp) + shift_mlp
    # TODO(synk): source MlpBlock declares Linear(4H,4H)/Linear(4H,4H) (shape
    # bug); intended H -> 4H -> H MLP (as in the original flax model) is used.
    h1 = jnp.dot(xm.astype(BF16), w1_ref[...],
                 preferred_element_type=F32) + b1_ref[...]
    h1 = _gelu(h1)
    h2 = jnp.dot(h1.astype(BF16), w2_ref[...],
                 preferred_element_type=F32) + b2_ref[...]
    o_ref[...] = (x1 + gate_mlp * h2)[None].astype(o_ref.dtype)


def proj_gate_mlp(attn, cmod, p):
    """proj + msa gate + LayerNorm + modulate + MLP + mlp gate, over (B, token tiles)."""
    B, N, H = attn.shape
    mlp_dim = p['mlp_w1'].shape[1]
    tn = _token_tile(N)

    def wspec(shp):
        return pl.BlockSpec(shp, lambda b, i: (0, 0))

    return pl.pallas_call(
        functools.partial(_proj_mlp_kernel, hidden=H),
        out_shape=jax.ShapeDtypeStruct((B, N, H), F32),
        grid=(B, N // tn),
        in_specs=[
            pl.BlockSpec((1, tn, H), lambda b, i: (b, i, 0)),
            pl.BlockSpec((1, 1, 6 * H), lambda b, i: (b, 0, 0)),
            wspec((H, H)), wspec((1, H)),
            wspec((H, mlp_dim)), wspec((1, mlp_dim)),
            wspec((mlp_dim, H)), wspec((1, H)),
        ],
        out_specs=pl.BlockSpec((1, tn, H), lambda b, i: (b, i, 0)),
        compiler_params=pltpu.CompilerParams(
            dimension_semantics=("parallel", "parallel"),
            vmem_limit_bytes=VMEM_LIMIT),
        cost_estimate=pl.CostEstimate(
            flops=2 * B * N * (H * H + 2 * H * mlp_dim),
            transcendentals=B * N * mlp_dim,
            bytes_accessed=2 * B * N * H + 4 * B * N * H
                           + 2 * (H * H + 2 * H * mlp_dim)),
    )(attn, cmod, p['proj_w'], p['proj_b'],
      p['mlp_w1'], p['mlp_b1'], p['mlp_w2'], p['mlp_b2'])


def dit_block(x, c, p, *, num_heads):
    B, N, H = x.shape
    dh = H // num_heads
    # adaLN dense runs once per batch element; its 6H^2 weights stay out of the
    # per-token kernels (cuts their resident VMEM by a third).
    # TODO(synk): torch.split(c, 6, dim=-1) in the source splits into chunks of
    # size 6 (shape bug, forward would crash); intended 6 equal chunks used.
    cmod = cond_modulation(c, p['ada_w'], p['ada_b'])            # (B, 1, 6H) f32

    qkv = norm_mod_qkv(x, cmod, p['qkv_w'], p['qkv_b'])           # (B, N, 3H) bf16
    # head split / merge is pure layout glue outside the kernels (no unaligned
    # in-kernel head slices, no in-kernel concatenate).
    qkv = qkv.reshape(B, N, 3, num_heads, dh).transpose(2, 0, 3, 1, 4)
    q, k, v = qkv[0], qkv[1], qkv[2]                              # (B, nh, N, dh)
    attn = attention(q, k, v)                                     # (B, nh, N, dh) bf16
    attn = attn.transpose(0, 2, 1, 3).reshape(B, N, H)

    return proj_gate_mlp(attn, cmod, p)                           # (B, N, H) f32


def _final_kernel(x_ref, cm_ref, fw_ref, fb_ref, o_ref, *, hidden):
    H = hidden
    x = x_ref[0]
    cm = cm_ref[0]
    # TODO(synk): torch.split(c, 2, dim=-1) chunk-size bug in source; intended
    # 2 equal chunks (shift, scale) used.
    shift = cm[:, 0:H]
    scale = cm[:, H:2 * H]
    xm = _layer_norm(x) * (1.0 + scale) + shift
    out = jnp.dot(xm.astype(BF16), fw_ref[...],
                  preferred_element_type=F32) + fb_ref[...]
    o_ref[...] = out[None].astype(o_ref.dtype)


def final_layer(x, c, p):
    B, N, H = x.shape
    out_dim = p['final_w'].shape[1]
    tn = _token_tile(N)
    cm = cond_modulation(c, p['dense_w'], p['dense_b'])           # (B, 1, 2H)
    return pl.pallas_call(
        functools.partial(_final_kernel, hidden=H),
        out_shape=jax.ShapeDtypeStruct((B, N, out_dim), F32),
        grid=(B, N // tn),
        in_specs=[
            pl.BlockSpec((1, tn, H), lambda b, i: (b, i, 0)),
            pl.BlockSpec((1, 1, 2 * H), lambda b, i: (b, 0, 0)),
            pl.BlockSpec((H, out_dim), lambda b, i: (0, 0)),
            pl.BlockSpec((1, out_dim), lambda b, i: (0, 0)),
        ],
        out_specs=pl.BlockSpec((1, tn, out_dim), lambda b, i: (b, i, 0)),
        compiler_params=pltpu.CompilerParams(
            dimension_semantics=("parallel", "parallel"),
            vmem_limit_bytes=VMEM_LIMIT),
        cost_estimate=pl.CostEstimate(
            flops=2 * B * N * H * out_dim, transcendentals=0,
            bytes_accessed=4 * B * N * H + 2 * H * out_dim + 4 * B * N * out_dim),
    )(x, cm, p['final_w'], p['final_b'])


# ----------------------------- parameters -------------------------------------

def xavier_uniform(key, in_dim, out_dim, gain=math.sqrt(2.0), dtype=BF16):
    limit = gain * math.sqrt(6.0 / (in_dim + out_dim))
    w = jax.random.uniform(key, (in_dim, out_dim), F32, -limit, limit)
    return w.astype(dtype)   # matmul weights stored bf16 (MXU-native operands)


def init_params(key, *, patch_size, hidden, depth, mlp_ratio, out_channels,
                num_classes, num_patches, in_channels=3, freq_dim=256):
    mlp_dim = int(hidden * mlp_ratio)
    keys = iter(jax.random.split(key, 4 + 5 * depth))

    def zf(*shp):
        return jnp.zeros(shp, F32)

    def zb(*shp):
        return jnp.zeros(shp, BF16)

    params = {
        # PatchEmbed conv (hidden, 3, p, p) as im2col matmul weight (p*p*3, hidden)
        'patch_w': xavier_uniform(next(keys), patch_size * patch_size * in_channels, hidden),
        'patch_b': zf(1, hidden),
        # TODO(synk): source pos_embed is zeros of shape (1, (256//p)**2, hidden)
        # (hard-codes 256x256 inputs); zeros of shape (1, num_patches, hidden) used.
        'pos_embed': zf(1, num_patches, hidden),
        'time_w1': xavier_uniform(next(keys), freq_dim, hidden, gain=1.0),
        'time_b1': zf(1, hidden),
        'time_w2': xavier_uniform(next(keys), hidden, hidden, gain=1.0),
        'time_b2': zf(1, hidden),
        # nn.init.normal_(weight, 0.02) => mean 0.02, std 1.0
        'label_table': 0.02 + jax.random.normal(next(keys), (num_classes + 1, hidden), F32),
        'blocks': [],
        'final': {  # FinalLayer is zero-initialized in the source.
            'dense_w': zb(hidden, 2 * hidden),
            'dense_b': zf(1, 2 * hidden),
            'final_w': zb(hidden, patch_size * patch_size * out_channels),
            'final_b': zf(1, patch_size * patch_size * out_channels),
        },
    }
    for _ in range(depth):
        params['blocks'].append({
            'ada_w': xavier_uniform(next(keys), hidden, 6 * hidden),
            'ada_b': zf(1, 6 * hidden),
            'qkv_w': xavier_uniform(next(keys), hidden, 3 * hidden, gain=1.0),
            'qkv_b': zf(1, 3 * hidden),
            'proj_w': xavier_uniform(next(keys), hidden, hidden, gain=1.0),
            'proj_b': zf(1, hidden),
            'mlp_w1': xavier_uniform(next(keys), hidden, mlp_dim),
            'mlp_b1': zf(1, mlp_dim),
            'mlp_w2': xavier_uniform(next(keys), mlp_dim, hidden),
            'mlp_b2': zf(1, hidden),
        })
    return params


# ----------------------------- forward ----------------------------------------

def dit_forward(params, x, t, dt, y, *, patch_size, hidden, num_heads,
                out_channels, ignore_dt=False):
    B, S, _, Cin = x.shape
    p = patch_size
    nps = S // p
    N = nps * nps

    if ignore_dt:
        dt = jnp.zeros_like(t)

    # patch embed: im2col (glue) + row-tiled Pallas matmul
    patches = (x.reshape(B, nps, p, nps, p, Cin)
                 .transpose(0, 1, 3, 2, 4, 5)
                 .reshape(B * N, p * p * Cin))
    xe = tiled_linear(patches, params['patch_w'], params['patch_b']).reshape(B, N, hidden)
    xe = (xe + params['pos_embed']).astype(F32)

    # conditioning: t and dt embedded in one batched MLP call
    emb = timestep_embedder(jnp.concatenate([t, dt], axis=0),
                            params['time_w1'], params['time_b1'],
                            params['time_w2'], params['time_b2'])
    te, dte = emb[:B], emb[B:]
    ye = params['label_table'][y]
    c = te + ye + dte                     # (B, hidden) f32

    for blk in params['blocks']:
        xe = dit_block(xe, c, blk, num_heads=num_heads)

    xo = final_layer(xe, c, params['final'])   # (B, N, p*p*out_channels)

    # unpatchify: 'b (h w) (p1 p2 c) -> b (h p1) (w p2) c'
    xo = (xo.reshape(B, nps, nps, p, p, out_channels)
            .transpose(0, 1, 3, 2, 4, 5)
            .reshape(B, S, S, out_channels))
    # NOTE: logvar_embed(t*256)*100 is only returned with return_activations=True;
    # the default forward returns x only, so it is omitted here.
    return xo


# ----------------------------- main --------------------------------------------

if __name__ == "__main__":
    B, S, Cin = 2, 16, 3
    patch_size, hidden, depth, num_heads = 2, 32, 2, 4
    mlp_ratio, out_channels, num_classes = 4.0, 3, 10
    nps = S // patch_size
    num_patches = nps * nps

    key = jax.random.PRNGKey(0)
    kx, kt, kdt, ky, kp = jax.random.split(key, 5)
    x = jax.random.normal(kx, (B, S, S, Cin), F32)
    t = jax.random.uniform(kt, (B,), F32)
    dt = jax.random.uniform(kdt, (B,), F32)
    y = jax.random.randint(ky, (B,), 0, num_classes)

    params = init_params(kp, patch_size=patch_size, hidden=hidden, depth=depth,
                         mlp_ratio=mlp_ratio, out_channels=out_channels,
                         num_classes=num_classes, num_patches=num_patches,
                         in_channels=Cin)

    out = dit_forward(params, x, t, dt, y, patch_size=patch_size, hidden=hidden,
                      num_heads=num_heads, out_channels=out_channels,
                      ignore_dt=False)
    out = jax.block_until_ready(out)
    assert out.shape == (B, S, S, out_channels), out.shape
    assert out.dtype == F32
    print("KERNEL_OK")
</pallas_src>

<mosaic_0001>
module attributes {stable_mosaic.version = 11 : i64} {
  func.func @_linear_kernel(%arg0: i32, %arg1: memref<128x12xf32, #tpu.memory_space<vmem>>, %arg2: memref<12x32xbf16, #tpu.memory_space<vmem>>, %arg3: memref<1x32xf32, #tpu.memory_space<vmem>>, %arg4: memref<128x32xf32, #tpu.memory_space<vmem>>) attributes {dimension_semantics = [#tpu.dimension_semantics<parallel>], iteration_bounds = array<i64: 1>, scalar_prefetch = 0 : i64, scratch_operands = 0 : i64, tpu.core_type = #tpu.core_type<tc>, window_params = [{transform_indices = @transform_0, window_bounds = array<i64: 128, 12>}, {pipeline_mode = #tpu.pipeline_mode<synchronous>, transform_indices = @transform_1, window_bounds = array<i64: 12, 32>}, {pipeline_mode = #tpu.pipeline_mode<synchronous>, transform_indices = @transform_2, window_bounds = array<i64: 1, 32>}, {transform_indices = @transform_3, window_bounds = array<i64: 128, 32>}]} {
    %c0 = arith.constant 0 : index
    %c0_0 = arith.constant 0 : index
    %0 = vector.load %arg1[%c0, %c0_0] : memref<128x12xf32, #tpu.memory_space<vmem>>, vector<128x12xf32>
    %1 = arith.truncf %0 : vector<128x12xf32> to vector<128x12xbf16>
    %c0_1 = arith.constant 0 : index
    %c0_2 = arith.constant 0 : index
    %2 = vector.load %arg2[%c0_1, %c0_2] : memref<12x32xbf16, #tpu.memory_space<vmem>>, vector<12x32xbf16>
    %cst = arith.constant dense<0.000000e+00> : vector<128x32xf32>
    %3 = tpu.matmul %1, %2, %cst {dimension_numbers = #tpu.dot_dimension_numbers<[1], [0], [0], [1], [0, 0, 1, 1], [], []>} : vector<128x12xbf16>, vector<12x32xbf16>, vector<128x32xf32> -> vector<128x32xf32>
    %c0_3 = arith.constant 0 : index
    %c0_4 = arith.constant 0 : index
    %4 = vector.load %arg3[%c0_3, %c0_4] : memref<1x32xf32, #tpu.memory_space<vmem>>, vector<1x32xf32>
    %5 = vector.broadcast %4 : vector<1x32xf32> to vector<128x32xf32>
    %6 = arith.addf %3, %5 : vector<128x32xf32>
    %c0_5 = arith.constant 0 : index
    %c0_6 = arith.constant 0 : index
    %7 = vector.load %arg4[%c0_5, %c0_6] : memref<128x32xf32, #tpu.memory_space<vmem>>, vector<128x32xf32>
    tpu.vector_store %arg4[%c0_5, %c0_6], %6 {strides = array<i32>} : memref<128x32xf32, #tpu.memory_space<vmem>>, vector<128x32xf32>,
    return
  }
  func.func @transform_0(%arg0: i32) -> (i32, i32) {
    %c0_i32 = arith.constant 0 : i32
    %c0_i32_0 = arith.constant 0 : i32
    return %arg0, %c0_i32 : i32, i32
  }
  func.func @transform_1(%arg0: i32) -> (i32, i32) {
    %c0_i32 = arith.constant 0 : i32
    %c0_i32_0 = arith.constant 0 : i32
    %c0_i32_1 = arith.constant 0 : i32
    return %c0_i32, %c0_i32_0 : i32, i32
  }
  func.func @transform_2(%arg0: i32) -> (i32, i32) {
    %c0_i32 = arith.constant 0 : i32
    %c0_i32_0 = arith.constant 0 : i32
    %c0_i32_1 = arith.constant 0 : i32
    return %c0_i32, %c0_i32_0 : i32, i32
  }
  func.func @transform_3(%arg0: i32) -> (i32, i32) {
    %c0_i32 = arith.constant 0 : i32
    %c0_i32_0 = arith.constant 0 : i32
    return %arg0, %c0_i32 : i32, i32
  }
}

</mosaic_0001>

<bundles_post_ra>
// kernel: tpu_custom_call.1
= control target key start
LH: loop header
LB: loop body
LE: loop exit
PB: predicated region body
PF: predicated region fallthrough
CT: control target
= control target key end

     0   :  { %vm75_vm0 = vcmask 1045504   ;;  %vm50_vm1 = vcmask 97280   ;;  %vm128_vm2 = vcmask 261120   ;;  %s315_s1 = inlined_call_operand.vmem [shape: bf16[12,32], index: 1, kind: input, shape index: {}]   ;;  %s316_s0 = inlined_call_operand.vmem [shape: f32[128,12], index: 0, kind: input, shape index: {}]   ;;  %s317_s2 = inlined_call_operand.vmem [shape: f32[1,32], index: 2, kind: input, shape index: {}]   ;;  %s318_s3 = inlined_call_operand.vmem [shape: f32[128,32], index: 3, kind: output, shape index: {}]  }
   0x1   :  { %v151_v0 = vld [vmem:[%s315_s1] sm:$0xf]  ;;  %v161_v1 = vld [vmem:[%s315_s1] sm:$0x30]  ;;  %v16_v4 = vld [vmem:[%s316_s0 + $0x8] sm:$0xff] }
   0x2   :  { %v15_v2 = vld [vmem:[%s316_s0] sm:$0xff]  ;;  %v152_v3 = vor.u32 %v161_v1, %v151_v0  ;;  %v20_v6 = vld [vmem:[%s316_s0 + $0x28] sm:$0xff]  ;;  %v17_v16 = vld [vmem:[%s316_s0 + $0x10] sm:$0xff] }
   0x3   :  { %v19_v5 = vld [vmem:[%s316_s0 + $0x20] sm:$0xff]  ;;  %v24_v8 = vld [vmem:[%s316_s0 + $0x48] sm:$0xff]  ;;  %v31_v11 = vpack.c.bf16 %v16_v4, %v15_v2  ;;  %v18_v17 = vld [vmem:[%s316_s0 + $0x18] sm:$0xff] }
   0x4   :  { %v23_v7 = vld [vmem:[%s316_s0 + $0x40] sm:$0xff]  ;;  %v77_v10 = vsel %vm75_vm0, %v152_v3, 0  ;;  %v33_v12 = vpack.c.bf16 %v20_v6, %v19_v5  ;;  %v28_v13 = vld [vmem:[%s316_s0 + $0x68] sm:$0xff]  ;;  %v21_v18 = vld [vmem:[%s316_s0 + $0x30] sm:$0xff]  ;;  %v32_v24 = vpack.c.bf16 %v18_v17, %v17_v16 }
   0x5   :  { %v27_v9 = vld [vmem:[%s316_s0 + $0x60] sm:$0xff]  ;;  %86 = vmatpush.bf16.msra.mxu0 %v77_v10  ;;  %162 = vmatpush.bf16.msra.mxu1 %v77_v10  ;;  %v35_v14 = vpack.c.bf16 %v24_v8, %v23_v7  ;;  %v22_v19 = vld [vmem:[%s316_s0 + $0x38] sm:$0xff]  ;;  %v25_v20 = vld [vmem:[%s316_s0 + $0x50] sm:$0xff] }
   0x6   :  { %v37_v15 = vpack.c.bf16 %v28_v13, %v27_v9  ;;  %163 = vmatpush.bf16.msra.mxu2 %v77_v10  ;;  %164 = vmatpush.bf16.msra.mxu3 %v77_v10  ;;  %v26_v21 = vld [vmem:[%s316_s0 + $0x58] sm:$0xff]  ;;  %v29_v22 = vld [vmem:[%s316_s0 + $0x70] sm:$0xff]  ;;  %v34_v25 = vpack.c.bf16 %v22_v19, %v21_v18  ;;  %v165_v28 = vld [vmem:[%s317_s2] ss:$0 sm:$0xff] }
   0x7   :  { %v30_v23 = vld [vmem:[%s316_s0 + $0x78] sm:$0xff]  ;;  %v36_v26 = vpack.c.bf16 %v26_v21, %v25_v20 }
   0x8   :  { %153 = vmatmul.msk.bf16.vlgmr.msra.gmra.mxu0 %vm50_vm1, %v31_v11  ;;  %155 = vmatmul.msk.bf16.vlgmr.msra.gmra.mxu1 %vm50_vm1, %v33_v12  ;;  %v38_v27 = vpack.c.bf16 %v30_v23, %v29_v22 }
   0x9   :  { %157 = vmatmul.msk.bf16.vlgmr.msra.gmra.mxu2 %vm50_vm1, %v35_v14  ;;  %159 = vmatmul.msk.bf16.vlgmr.msra.gmra.mxu3 %vm50_vm1, %v37_v15 }
  0x18   :  { %154 = vmatmul.msk.bf16.gmra.mxu0 %vm50_vm1, %v32_v24  ;;  %156 = vmatmul.msk.bf16.gmra.mxu1 %vm50_vm1, %v34_v25 }
  0x19   :  { %158 = vmatmul.msk.bf16.gmra.mxu2 %vm50_vm1, %v36_v26  ;;  %160 = vmatmul.msk.bf16.gmra.mxu3 %vm50_vm1, %v38_v27 }
  0x85   :  { %v88_v29 = vpop.f32.mrf.mxu0  ;;  %v98_v30 = vpop.f32.mrf.mxu1 }
  0x86   :  { %v89_v31 = vadd.f32 %v165_v28, %v88_v29  ;;  %v99_v32 = vadd.f32 %v165_v28, %v98_v30 }
  0x88   :  { %129 = vst.msk [vmem:[%s318_s3] sm:$0xff] %vm128_vm2, %v89_v31 }
  0x89   :  { %133 = vst.msk [vmem:[%s318_s3 + $0x20] sm:$0xff] %vm128_vm2, %v99_v32 }
  0x8c   :  { %v108_v33 = vpop.f32.mrf.mxu2  ;;  %v118_v34 = vpop.f32.mrf.mxu3 }
  0x8d   :  { %v109_v35 = vadd.f32 %v165_v28, %v108_v33  ;;  %v119_v36 = vadd.f32 %v165_v28, %v118_v34  ;;  %v90_v37 = vpop.f32.mrf.mxu0  ;;  %v100_v38 = vpop.f32.mrf.mxu1 }
  0x8e   :  { %v91_v39 = vadd.f32 %v165_v28, %v90_v37  ;;  %v101_v40 = vadd.f32 %v165_v28, %v100_v38 }
  0x8f   :  { %137 = vst.msk [vmem:[%s318_s3 + $0x40] sm:$0xff] %vm128_vm2, %v109_v35 }
  0x90   :  { %141 = vst.msk [vmem:[%s318_s3 + $0x60] sm:$0xff] %vm128_vm2, %v119_v36 }
  0x91   :  { %130 = vst.msk [vmem:[%s318_s3 + $0x8] sm:$0xff] %vm128_vm2, %v91_v39 }
  0x92   :  { %134 = vst.msk [vmem:[%s318_s3 + $0x28] sm:$0xff] %vm128_vm2, %v101_v40 }
  0x94   :  { %v110_v41 = vpop.f32.mrf.mxu2  ;;  %v120_v42 = vpop.f32.mrf.mxu3 }
  0x95   :  { %v111_v43 = vadd.f32 %v165_v28, %v110_v41  ;;  %v121_v44 = vadd.f32 %v165_v28, %v120_v42  ;;  %v93_v45 = vpop.f32.mrf.mxu0  ;;  %v103_v46 = vpop.f32.mrf.mxu1 }
  0x96   :  { %v94_v47 = vadd.f32 %v165_v28, %v93_v45  ;;  %v104_v48 = vadd.f32 %v165_v28, %v103_v46 }
  0x97   :  { %138 = vst.msk [vmem:[%s318_s3 + $0x48] sm:$0xff] %vm128_vm2, %v111_v43 }
  0x98   :  { %142 = vst.msk [vmem:[%s318_s3 + $0x68] sm:$0xff] %vm128_vm2, %v121_v44 }
  0x99   :  { %131 = vst.msk [vmem:[%s318_s3 + $0x10] sm:$0xff] %vm128_vm2, %v94_v47 }
  0x9a   :  { %135 = vst.msk [vmem:[%s318_s3 + $0x30] sm:$0xff] %vm128_vm2, %v104_v48 }
  0x9c   :  { %v113_v49 = vpop.f32.mrf.mxu2  ;;  %v123_v50 = vpop.f32.mrf.mxu3 }
  0x9d   :  { %v114_v51 = vadd.f32 %v165_v28, %v113_v49  ;;  %v124_v52 = vadd.f32 %v165_v28, %v123_v50  ;;  %v95_v53 = vpop.f32.mrf.mxu0  ;;  %v105_v54 = vpop.f32.mrf.mxu1 }
  0x9e   :  { %v96_v55 = vadd.f32 %v165_v28, %v95_v53  ;;  %v106_v56 = vadd.f32 %v165_v28, %v105_v54 }
  0x9f   :  { %139 = vst.msk [vmem:[%s318_s3 + $0x50] sm:$0xff] %vm128_vm2, %v114_v51 }
  0xa0   :  { %143 = vst.msk [vmem:[%s318_s3 + $0x70] sm:$0xff] %vm128_vm2, %v124_v52 }
  0xa1   :  { %132 = vst.msk [vmem:[%s318_s3 + $0x18] sm:$0xff] %vm128_vm2, %v96_v55 }
  0xa2   :  { %136 = vst.msk [vmem:[%s318_s3 + $0x38] sm:$0xff] %vm128_vm2, %v106_v56 }
  0xa4   :  { %v115_v57 = vpop.f32.mrf.mxu2  ;;  %v125_v58 = vpop.f32.mrf.mxu3 }
  0xa5   :  { %v116_v59 = vadd.f32 %v165_v28, %v115_v57  ;;  %v126_v60 = vadd.f32 %v165_v28, %v125_v58 }
  0xa7   :  { %140 = vst.msk [vmem:[%s318_s3 + $0x58] sm:$0xff] %vm128_vm2, %v116_v59 }
  0xa8   :  { %144 = vst.msk [vmem:[%s318_s3 + $0x78] sm:$0xff] %vm128_vm2, %v126_v60 }

</bundles_post_ra>
